<compile_context>
chip_gen: v5e
topology: v5e:2x2
jax: 0.10.0
libtpu: 0.0.40
codegen_flags: <defaults>
</compile_context>

<pallas_src>
import functools

import jax
import jax.numpy as jnp
from jax.experimental import pallas as pl
from jax.experimental.pallas import tpu as pltpu


# --------------------------------------------------------------------------
# Shared conv helper: per-batch conv block in NCL orientation.
# --------------------------------------------------------------------------
def _conv_block(x_ref, w_ref, *, kernel_size, stride, l_out, pad):
    """Compute the (bias-free) conv for every batch element in the block.

    x_ref: (B, C_in, L)      fp32  (cast to bf16 here, halo padded in VMEM)
    w_ref: (K, C_out, C_in)  bf16  (per-tap weight matrices)
    returns: list of B fp32 arrays of shape (C_out, l_out)
    """
    x = x_ref[...]                                   # (B, C_in, L) fp32
    bsz, c_in, _ = x.shape

    # Halo zero-padding along the length (lane) axis, entirely in VMEM.
    if pad > 0:
        z = jnp.zeros((bsz, c_in, pad), x.dtype)
        x = jnp.concatenate([z, x, z], axis=-1)      # (B, C_in, L + 2*pad)
    x = x.astype(jnp.bfloat16)                       # MXU-native operand

    span = (l_out - 1) * stride + 1
    outs = []
    for b in range(bsz):                             # bsz is small & static
        acc = None
        for k in range(kernel_size):
            # TODO(synk): the stride>1 lane-strided slice is untested on
            # Mosaic; the test below exercises stride == 1 (plain slices).
            xs = x[b, :, k:k + span:stride]          # (C_in, l_out) bf16
            wk = w_ref[k]                            # (C_out, C_in) bf16
            t = jnp.dot(wk, xs, preferred_element_type=jnp.float32)
            acc = t if acc is None else acc + t
        outs.append(acc)                             # (C_out, l_out) fp32
    return outs


# --------------------------------------------------------------------------
# Pass 1: conv (in VMEM only) + per-block BN partial sums.  Only the tiny
# stats tensor touches HBM.
# --------------------------------------------------------------------------
def _stats_kernel(x_ref, w_ref, stats_ref, *, kernel_size, stride, l_out, pad):
    accs = _conv_block(x_ref, w_ref, kernel_size=kernel_size, stride=stride,
                       l_out=l_out, pad=pad)
    c_out = accs[0].shape[0]
    s = jnp.zeros((c_out, 1), jnp.float32)
    sq = jnp.zeros((c_out, 1), jnp.float32)
    for acc in accs:
        s = s + jnp.sum(acc, axis=-1, keepdims=True)
        sq = sq + jnp.sum(acc * acc, axis=-1, keepdims=True)
    # Two separate stores (no concat): column 0 = sum, column 1 = sum of sq.
    stats_ref[0, :, 0:1] = s
    stats_ref[0, :, 1:2] = sq


# --------------------------------------------------------------------------
# Pass 2: recompute the cheap conv, apply folded BN affine + ReLU, store the
# output directly in NCL layout (no padded channels, no transposes).
# --------------------------------------------------------------------------
def _apply_kernel(x_ref, w_ref, scale_ref, shift_ref, o_ref, *,
                  kernel_size, stride, l_out, pad):
    accs = _conv_block(x_ref, w_ref, kernel_size=kernel_size, stride=stride,
                       l_out=l_out, pad=pad)
    scale = scale_ref[...]                           # (C_out, 1) fp32
    shift = shift_ref[...]                           # (C_out, 1) fp32
    for b, acc in enumerate(accs):
        y = jnp.maximum(acc * scale + shift, 0.0)    # BN affine + ReLU, fp32
        o_ref[b] = y.astype(o_ref.dtype)             # (C_out, l_out)


# --------------------------------------------------------------------------
# Batch-block selection: biggest divisor of N that fits the VMEM budget,
# keeps the unrolled per-batch loop small, and leaves >= 2 grid steps so both
# v7x TensorCores get work.
# --------------------------------------------------------------------------
def _pick_batch_block(n, per_elem_bytes, vmem_budget_bytes=8 << 20,
                      max_unroll=8):
    cap = max(1, min(max_unroll, vmem_budget_bytes // max(per_elem_bytes, 1)))
    best = 1
    for b in range(1, n + 1):
        if n % b == 0 and b <= cap and (n // b >= 2 or n <= 1):
            best = b
    return best


# --------------------------------------------------------------------------
# Wrapper: PyTorch-equivalent forward.  x_ncl: (N, C_in, L) -> (N, C_out, L_out)
# --------------------------------------------------------------------------
@functools.partial(jax.jit, static_argnames=("stride", "eps"))
def conv_bn_relu(x_ncl, weight_oik, bias, gamma, beta, *, stride=1, eps=1e-5):
    n, c_in, l = x_ncl.shape
    c_out, _, k = weight_oik.shape
    pad = k // 2
    l_out = (l + 2 * pad - k) // stride + 1

    # NOTE: `bias` is intentionally not used by the kernels.  With training-
    # mode BatchNorm a per-channel conv bias cancels exactly against the mean
    # subtraction, so the forward output is mathematically unchanged
    # (verified against the biased reference below).

    # Per-tap weight matrices W_k = weight[:, :, k] -> (K, C_out, C_in), bf16.
    w_t = jnp.transpose(weight_oik, (2, 0, 1)).astype(jnp.bfloat16)

    x = x_ncl.astype(jnp.float32)                    # stays NCL end-to-end

    # Rough per-element VMEM footprint: double-buffered x & out blocks plus
    # in-kernel fp32/bf16 working copies.  Budgeted for v7x's 64 MiB VMEM.
    per_elem = (4 * (2 * c_in * l + 3 * c_out * l_out)
                + 2 * c_in * (l + 2 * pad))
    bsz = _pick_batch_block(n, per_elem)
    num_blocks = n // bsz
    vmem_limit = 32 * 1024 * 1024                    # safe on v5e/v6e/v7x

    conv_flops = 2 * n * l_out * k * c_in * c_out

    # ---------------- Pass 1: statistics only ----------------
    cost_stats = pl.CostEstimate(
        flops=conv_flops + 3 * n * c_out * l_out,
        transcendentals=0,
        bytes_accessed=x.size * 4 + w_t.size * 2 + num_blocks * c_out * 2 * 4)

    part_stats = pl.pallas_call(
        functools.partial(_stats_kernel, kernel_size=k, stride=stride,
                          l_out=l_out, pad=pad),
        out_shape=jax.ShapeDtypeStruct((num_blocks, c_out, 2), jnp.float32),
        grid_spec=pltpu.PrefetchScalarGridSpec(
            num_scalar_prefetch=0,
            grid=(num_blocks,),
            in_specs=[pl.BlockSpec((bsz, c_in, l), lambda i: (i, 0, 0)),
                      pl.BlockSpec((k, c_out, c_in), lambda i: (0, 0, 0))],
            out_specs=pl.BlockSpec((1, c_out, 2), lambda i: (i, 0, 0))),
        compiler_params=pltpu.CompilerParams(
            dimension_semantics=("parallel",),
            vmem_limit_bytes=vmem_limit),
        cost_estimate=cost_stats,
    )(x, w_t)

    # Tiny per-channel reduction + BN affine folding (fp32, plain JAX).
    totals = jnp.sum(part_stats, axis=0)             # (C_out, 2)
    count = float(n * l_out)
    mean = totals[:, 0] / count
    var = jnp.maximum(totals[:, 1] / count - mean * mean, 0.0)  # biased var
    # TODO(synk): E[x^2]-E[x]^2 can cancel when |mean| >> std; switch to a
    # shifted/Welford combine if activations can have large means.
    scale1 = gamma.astype(jnp.float32) * jax.lax.rsqrt(var + eps)
    shift1 = beta.astype(jnp.float32) - mean * scale1
    scale = scale1.reshape(c_out, 1)
    shift = shift1.reshape(c_out, 1)

    # ---------------- Pass 2: recompute conv + fused BN/ReLU ----------------
    cost_apply = pl.CostEstimate(
        flops=conv_flops + 3 * n * c_out * l_out,
        transcendentals=0,
        bytes_accessed=(x.size * 4 + w_t.size * 2 + 2 * c_out * 4
                        + n * c_out * l_out * 4))

    out = pl.pallas_call(
        functools.partial(_apply_kernel, kernel_size=k, stride=stride,
                          l_out=l_out, pad=pad),
        out_shape=jax.ShapeDtypeStruct((n, c_out, l_out), jnp.float32),
        grid_spec=pltpu.PrefetchScalarGridSpec(
            num_scalar_prefetch=0,
            grid=(num_blocks,),
            in_specs=[pl.BlockSpec((bsz, c_in, l), lambda i: (i, 0, 0)),
                      pl.BlockSpec((k, c_out, c_in), lambda i: (0, 0, 0)),
                      pl.BlockSpec((c_out, 1), lambda i: (0, 0)),
                      pl.BlockSpec((c_out, 1), lambda i: (0, 0))],
            out_specs=pl.BlockSpec((bsz, c_out, l_out), lambda i: (i, 0, 0))),
        compiler_params=pltpu.CompilerParams(
            dimension_semantics=("parallel",),
            vmem_limit_bytes=vmem_limit),
        cost_estimate=cost_apply,
    )(x, w_t, scale, shift)

    return out                                        # (N, C_out, L_out), NCL


# --------------------------------------------------------------------------
# Pure-JAX fp32 reference (training-mode BN, biased variance), with bias.
# --------------------------------------------------------------------------
def _reference(x_ncl, w, b, gamma, beta, stride, eps):
    pad = w.shape[2] // 2
    conv = jax.lax.conv_general_dilated(
        x_ncl, w, window_strides=(stride,), padding=[(pad, pad)],
        dimension_numbers=('NCH', 'OIH', 'NCH'),
        precision=jax.lax.Precision.HIGHEST)
    conv = conv + b[None, :, None]
    mean = conv.mean(axis=(0, 2), keepdims=True)
    var = ((conv - mean) ** 2).mean(axis=(0, 2), keepdims=True)
    y = (conv - mean) * jax.lax.rsqrt(var + eps)
    y = y * gamma[None, :, None] + beta[None, :, None]
    return jnp.maximum(y, 0.0)


if __name__ == "__main__":
    # Small shapes consistent with the module: Conv1d(in=4, out=8, k=3), L=16.
    N, C_IN, C_OUT, L, K, STRIDE = 2, 4, 8, 16, 3, 1
    EPS = 1e-5

    key = jax.random.PRNGKey(0)
    kx, kw, kb = jax.random.split(key, 3)

    x = jax.random.normal(kx, (N, C_IN, L), dtype=jnp.float32)

    # Deterministic parameter init (PyTorch-like uniform bound 1/sqrt(C_in*K)).
    bound = 1.0 / (C_IN * K) ** 0.5
    weight = jax.random.uniform(kw, (C_OUT, C_IN, K), jnp.float32, -bound, bound)
    bias = jax.random.uniform(kb, (C_OUT,), jnp.float32, -bound, bound)
    gamma = jnp.ones((C_OUT,), jnp.float32)   # BN default weight
    beta = jnp.zeros((C_OUT,), jnp.float32)   # BN default bias

    out = conv_bn_relu(x, weight, bias, gamma, beta, stride=STRIDE, eps=EPS)
    out = jax.block_until_ready(out)

    # Tight check: reference fed the same bf16-rounded operands the kernel's
    # MXU matmuls see (fp32 accumulation everywhere) -> only accumulation
    # order / exact bias-cancellation rounding differences remain.
    x_r = x.astype(jnp.bfloat16).astype(jnp.float32)
    w_r = weight.astype(jnp.bfloat16).astype(jnp.float32)
    ref_tight = _reference(x_r, w_r, bias, gamma, beta, STRIDE, EPS)
    if not bool(jnp.allclose(out, ref_tight, rtol=1e-4, atol=1e-4)):
        raise AssertionError("Pallas ConvBnRelu mismatch vs bf16-operand reference")

    # Loose check vs full-fp32 module semantics: the only extra error is the
    # documented bf16 rounding of the matmul operands.
    ref_f32 = _reference(x, weight, bias, gamma, beta, STRIDE, EPS)
    if not bool(jnp.allclose(out, ref_f32, rtol=1e-1, atol=1e-1)):
        raise AssertionError("Pallas ConvBnRelu mismatch vs fp32 reference")

    print("KERNEL_OK")
</pallas_src>

<mosaic_0001>
module attributes {stable_mosaic.version = 11 : i64} {
  func.func @_stats_kernel(%arg0: i32, %arg1: memref<1x4x16xf32, #tpu.memory_space<vmem>>, %arg2: memref<3x8x4xbf16, #tpu.memory_space<vmem>>, %arg3: memref<1x8x2xf32, #tpu.memory_space<vmem>>) attributes {dimension_semantics = [#tpu.dimension_semantics<parallel>], iteration_bounds = array<i64: 2>, scalar_prefetch = 0 : i64, scratch_operands = 0 : i64, tpu.core_type = #tpu.core_type<tc>, window_params = [{transform_indices = @transform_0, window_bounds = array<i64: 1, 4, 16>}, {pipeline_mode = #tpu.pipeline_mode<synchronous>, transform_indices = @transform_1, window_bounds = array<i64: 3, 8, 4>}, {transform_indices = @transform_2, window_bounds = array<i64: 1, 8, 2>}]} {
    %c0 = arith.constant 0 : index
    %c0_0 = arith.constant 0 : index
    %c0_1 = arith.constant 0 : index
    %0 = vector.load %arg1[%c0, %c0_0, %c0_1] : memref<1x4x16xf32, #tpu.memory_space<vmem>>, vector<1x4x16xf32>
    %cst = arith.constant 0.000000e+00 : f32
    %1 = vector.broadcast %cst : f32 to vector<1x4x1xf32>
    %2 = tpu.concatenate %1, %0, %1 in 2 : vector<1x4x1xf32>, vector<1x4x16xf32>, vector<1x4x1xf32> -> vector<1x4x18xf32>
    %3 = arith.truncf %2 : vector<1x4x18xf32> to vector<1x4x18xbf16>
    %4 = vector.extract_strided_slice %3 {offsets = [0, 0, 0], sizes = [1, 4, 16], strides = [1, 1, 1]} : vector<1x4x18xbf16> to vector<1x4x16xbf16>
    %5 = vector.shape_cast %4 : vector<1x4x16xbf16> to vector<4x16xbf16>
    %c0_2 = arith.constant 0 : index
    %c0_3 = arith.constant 0 : index
    %c0_4 = arith.constant 0 : index
    %6 = vector.load %arg2[%c0_2, %c0_3, %c0_4] : memref<3x8x4xbf16, #tpu.memory_space<vmem>>, vector<1x8x4xbf16>
    %7 = vector.shape_cast %6 : vector<1x8x4xbf16> to vector<8x4xbf16>
    %cst_5 = arith.constant dense<0.000000e+00> : vector<8x16xf32>
    %8 = tpu.matmul %7, %5, %cst_5 {dimension_numbers = #tpu.dot_dimension_numbers<[1], [0], [0], [1], [0, 0, 1, 1], [], []>} : vector<8x4xbf16>, vector<4x16xbf16>, vector<8x16xf32> -> vector<8x16xf32>
    %9 = vector.extract_strided_slice %3 {offsets = [0, 0, 1], sizes = [1, 4, 16], strides = [1, 1, 1]} : vector<1x4x18xbf16> to vector<1x4x16xbf16>
    %10 = vector.shape_cast %9 : vector<1x4x16xbf16> to vector<4x16xbf16>
    %c1 = arith.constant 1 : index
    %c0_6 = arith.constant 0 : index
    %c0_7 = arith.constant 0 : index
    %11 = vector.load %arg2[%c1, %c0_6, %c0_7] : memref<3x8x4xbf16, #tpu.memory_space<vmem>>, vector<1x8x4xbf16>
    %12 = vector.shape_cast %11 : vector<1x8x4xbf16> to vector<8x4xbf16>
    %cst_8 = arith.constant dense<0.000000e+00> : vector<8x16xf32>
    %13 = tpu.matmul %12, %10, %cst_8 {dimension_numbers = #tpu.dot_dimension_numbers<[1], [0], [0], [1], [0, 0, 1, 1], [], []>} : vector<8x4xbf16>, vector<4x16xbf16>, vector<8x16xf32> -> vector<8x16xf32>
    %14 = arith.addf %8, %13 : vector<8x16xf32>
    %15 = vector.extract_strided_slice %3 {offsets = [0, 0, 2], sizes = [1, 4, 16], strides = [1, 1, 1]} : vector<1x4x18xbf16> to vector<1x4x16xbf16>
    %16 = vector.shape_cast %15 : vector<1x4x16xbf16> to vector<4x16xbf16>
    %c2 = arith.constant 2 : index
    %c0_9 = arith.constant 0 : index
    %c0_10 = arith.constant 0 : index
    %17 = vector.load %arg2[%c2, %c0_9, %c0_10] : memref<3x8x4xbf16, #tpu.memory_space<vmem>>, vector<1x8x4xbf16>
    %18 = vector.shape_cast %17 : vector<1x8x4xbf16> to vector<8x4xbf16>
    %cst_11 = arith.constant dense<0.000000e+00> : vector<8x16xf32>
    %19 = tpu.matmul %18, %16, %cst_11 {dimension_numbers = #tpu.dot_dimension_numbers<[1], [0], [0], [1], [0, 0, 1, 1], [], []>} : vector<8x4xbf16>, vector<4x16xbf16>, vector<8x16xf32> -> vector<8x16xf32>
    %20 = arith.addf %14, %19 : vector<8x16xf32>
    %cst_12 = arith.constant 0.000000e+00 : f32
    %21 = vector.broadcast %cst_12 : f32 to vector<8x1xf32>
    %cst_13 = arith.constant 0.000000e+00 : f32
    %22 = vector.broadcast %cst_13 : f32 to vector<8x1xf32>
    %cst_14 = arith.constant dense<0.000000e+00> : vector<8xf32>
    %23 = vector.multi_reduction <add>, %20, %cst_14 [1] : vector<8x16xf32> to vector<8xf32>
    %24 = vector.shape_cast %23 : vector<8xf32> to vector<8x1xf32>
    %25 = arith.addf %21, %24 : vector<8x1xf32>
    %26 = arith.mulf %20, %20 : vector<8x16xf32>
    %cst_15 = arith.constant dense<0.000000e+00> : vector<8xf32>
    %27 = vector.multi_reduction <add>, %26, %cst_15 [1] : vector<8x16xf32> to vector<8xf32>
    %28 = vector.shape_cast %27 : vector<8xf32> to vector<8x1xf32>
    %29 = arith.addf %22, %28 : vector<8x1xf32>
    %c0_16 = arith.constant 0 : index
    %c0_17 = arith.constant 0 : index
    %c0_18 = arith.constant 0 : index
    %30 = vector.load %arg3[%c0_16, %c0_17, %c0_18] : memref<1x8x2xf32, #tpu.memory_space<vmem>>, vector<1x8x1xf32>
    %31 = vector.shape_cast %30 : vector<1x8x1xf32> to vector<8x1xf32>
    %32 = vector.shape_cast %25 : vector<8x1xf32> to vector<1x8x1xf32>
    tpu.vector_store %arg3[%c0_16, %c0_17, %c0_18], %32 {strides = array<i32>} : memref<1x8x2xf32, #tpu.memory_space<vmem>>, vector<1x8x1xf32>,
    %c0_19 = arith.constant 0 : index
    %c0_20 = arith.constant 0 : index
    %c1_21 = arith.constant 1 : index
    %33 = vector.load %arg3[%c0_19, %c0_20, %c1_21] : memref<1x8x2xf32, #tpu.memory_space<vmem>>, vector<1x8x1xf32>
    %34 = vector.shape_cast %33 : vector<1x8x1xf32> to vector<8x1xf32>
    %35 = vector.shape_cast %29 : vector<8x1xf32> to vector<1x8x1xf32>
    tpu.vector_store %arg3[%c0_19, %c0_20, %c1_21], %35 {strides = array<i32>} : memref<1x8x2xf32, #tpu.memory_space<vmem>>, vector<1x8x1xf32>,
    return
  }
  func.func @transform_0(%arg0: i32) -> (i32, i32, i32) {
    %c0_i32 = arith.constant 0 : i32
    %c0_i32_0 = arith.constant 0 : i32
    %c0_i32_1 = arith.constant 0 : i32
    return %arg0, %c0_i32, %c0_i32_0 : i32, i32, i32
  }
  func.func @transform_1(%arg0: i32) -> (i32, i32, i32) {
    %c0_i32 = arith.constant 0 : i32
    %c0_i32_0 = arith.constant 0 : i32
    %c0_i32_1 = arith.constant 0 : i32
    %c0_i32_2 = arith.constant 0 : i32
    return %c0_i32, %c0_i32_0, %c0_i32_1 : i32, i32, i32
  }
  func.func @transform_2(%arg0: i32) -> (i32, i32, i32) {
    %c0_i32 = arith.constant 0 : i32
    %c0_i32_0 = arith.constant 0 : i32
    %c0_i32_1 = arith.constant 0 : i32
    return %arg0, %c0_i32, %c0_i32_0 : i32, i32, i32
  }
}

module attributes {stable_mosaic.version = 11 : i64} {
  func.func @_apply_kernel(%arg0: i32, %arg1: memref<1x4x16xf32, #tpu.memory_space<vmem>>, %arg2: memref<3x8x4xbf16, #tpu.memory_space<vmem>>, %arg3: memref<8x1xf32, #tpu.memory_space<vmem>>, %arg4: memref<8x1xf32, #tpu.memory_space<vmem>>, %arg5: memref<1x8x16xf32, #tpu.memory_space<vmem>>) attributes {dimension_semantics = [#tpu.dimension_semantics<parallel>], iteration_bounds = array<i64: 2>, scalar_prefetch = 0 : i64, scratch_operands = 0 : i64, tpu.core_type = #tpu.core_type<tc>, window_params = [{transform_indices = @transform_0, window_bounds = array<i64: 1, 4, 16>}, {pipeline_mode = #tpu.pipeline_mode<synchronous>, transform_indices = @transform_1, window_bounds = array<i64: 3, 8, 4>}, {pipeline_mode = #tpu.pipeline_mode<synchronous>, transform_indices = @transform_2, window_bounds = array<i64: 8, 1>}, {pipeline_mode = #tpu.pipeline_mode<synchronous>, transform_indices = @transform_3, window_bounds = array<i64: 8, 1>}, {transform_indices = @transform_4, window_bounds = array<i64: 1, 8, 16>}]} {
    %c0 = arith.constant 0 : index
    %c0_0 = arith.constant 0 : index
    %c0_1 = arith.constant 0 : index
    %0 = vector.load %arg1[%c0, %c0_0, %c0_1] : memref<1x4x16xf32, #tpu.memory_space<vmem>>, vector<1x4x16xf32>
    %cst = arith.constant 0.000000e+00 : f32
    %1 = vector.broadcast %cst : f32 to vector<1x4x1xf32>
    %2 = tpu.concatenate %1, %0, %1 in 2 : vector<1x4x1xf32>, vector<1x4x16xf32>, vector<1x4x1xf32> -> vector<1x4x18xf32>
    %3 = arith.truncf %2 : vector<1x4x18xf32> to vector<1x4x18xbf16>
    %4 = vector.extract_strided_slice %3 {offsets = [0, 0, 0], sizes = [1, 4, 16], strides = [1, 1, 1]} : vector<1x4x18xbf16> to vector<1x4x16xbf16>
    %5 = vector.shape_cast %4 : vector<1x4x16xbf16> to vector<4x16xbf16>
    %c0_2 = arith.constant 0 : index
    %c0_3 = arith.constant 0 : index
    %c0_4 = arith.constant 0 : index
    %6 = vector.load %arg2[%c0_2, %c0_3, %c0_4] : memref<3x8x4xbf16, #tpu.memory_space<vmem>>, vector<1x8x4xbf16>
    %7 = vector.shape_cast %6 : vector<1x8x4xbf16> to vector<8x4xbf16>
    %cst_5 = arith.constant dense<0.000000e+00> : vector<8x16xf32>
    %8 = tpu.matmul %7, %5, %cst_5 {dimension_numbers = #tpu.dot_dimension_numbers<[1], [0], [0], [1], [0, 0, 1, 1], [], []>} : vector<8x4xbf16>, vector<4x16xbf16>, vector<8x16xf32> -> vector<8x16xf32>
    %9 = vector.extract_strided_slice %3 {offsets = [0, 0, 1], sizes = [1, 4, 16], strides = [1, 1, 1]} : vector<1x4x18xbf16> to vector<1x4x16xbf16>
    %10 = vector.shape_cast %9 : vector<1x4x16xbf16> to vector<4x16xbf16>
    %c1 = arith.constant 1 : index
    %c0_6 = arith.constant 0 : index
    %c0_7 = arith.constant 0 : index
    %11 = vector.load %arg2[%c1, %c0_6, %c0_7] : memref<3x8x4xbf16, #tpu.memory_space<vmem>>, vector<1x8x4xbf16>
    %12 = vector.shape_cast %11 : vector<1x8x4xbf16> to vector<8x4xbf16>
    %cst_8 = arith.constant dense<0.000000e+00> : vector<8x16xf32>
    %13 = tpu.matmul %12, %10, %cst_8 {dimension_numbers = #tpu.dot_dimension_numbers<[1], [0], [0], [1], [0, 0, 1, 1], [], []>} : vector<8x4xbf16>, vector<4x16xbf16>, vector<8x16xf32> -> vector<8x16xf32>
    %14 = arith.addf %8, %13 : vector<8x16xf32>
    %15 = vector.extract_strided_slice %3 {offsets = [0, 0, 2], sizes = [1, 4, 16], strides = [1, 1, 1]} : vector<1x4x18xbf16> to vector<1x4x16xbf16>
    %16 = vector.shape_cast %15 : vector<1x4x16xbf16> to vector<4x16xbf16>
    %c2 = arith.constant 2 : index
    %c0_9 = arith.constant 0 : index
    %c0_10 = arith.constant 0 : index
    %17 = vector.load %arg2[%c2, %c0_9, %c0_10] : memref<3x8x4xbf16, #tpu.memory_space<vmem>>, vector<1x8x4xbf16>
    %18 = vector.shape_cast %17 : vector<1x8x4xbf16> to vector<8x4xbf16>
    %cst_11 = arith.constant dense<0.000000e+00> : vector<8x16xf32>
    %19 = tpu.matmul %18, %16, %cst_11 {dimension_numbers = #tpu.dot_dimension_numbers<[1], [0], [0], [1], [0, 0, 1, 1], [], []>} : vector<8x4xbf16>, vector<4x16xbf16>, vector<8x16xf32> -> vector<8x16xf32>
    %20 = arith.addf %14, %19 : vector<8x16xf32>
    %c0_12 = arith.constant 0 : index
    %c0_13 = arith.constant 0 : index
    %21 = vector.load %arg3[%c0_12, %c0_13] : memref<8x1xf32, #tpu.memory_space<vmem>>, vector<8x1xf32>
    %c0_14 = arith.constant 0 : index
    %c0_15 = arith.constant 0 : index
    %22 = vector.load %arg4[%c0_14, %c0_15] : memref<8x1xf32, #tpu.memory_space<vmem>>, vector<8x1xf32>
    %23 = vector.broadcast %21 : vector<8x1xf32> to vector<8x16xf32>
    %24 = arith.mulf %20, %23 : vector<8x16xf32>
    %25 = vector.broadcast %22 : vector<8x1xf32> to vector<8x16xf32>
    %26 = arith.addf %24, %25 : vector<8x16xf32>
    %cst_16 = arith.constant 0.000000e+00 : f32
    %27 = vector.broadcast %cst_16 : f32 to vector<8x16xf32>
    %28 = arith.maximumf %26, %27 : vector<8x16xf32>
    %c0_17 = arith.constant 0 : index
    %c0_18 = arith.constant 0 : index
    %c0_19 = arith.constant 0 : index
    %29 = vector.load %arg5[%c0_17, %c0_18, %c0_19] : memref<1x8x16xf32, #tpu.memory_space<vmem>>, vector<1x8x16xf32>
    %30 = vector.shape_cast %29 : vector<1x8x16xf32> to vector<8x16xf32>
    %31 = vector.shape_cast %28 : vector<8x16xf32> to vector<1x8x16xf32>
    tpu.vector_store %arg5[%c0_17, %c0_18, %c0_19], %31 {strides = array<i32>} : memref<1x8x16xf32, #tpu.memory_space<vmem>>, vector<1x8x16xf32>,
    return
  }
  func.func @transform_0(%arg0: i32) -> (i32, i32, i32) {
    %c0_i32 = arith.constant 0 : i32
    %c0_i32_0 = arith.constant 0 : i32
    %c0_i32_1 = arith.constant 0 : i32
    return %arg0, %c0_i32, %c0_i32_0 : i32, i32, i32
  }
  func.func @transform_1(%arg0: i32) -> (i32, i32, i32) {
    %c0_i32 = arith.constant 0 : i32
    %c0_i32_0 = arith.constant 0 : i32
    %c0_i32_1 = arith.constant 0 : i32
    %c0_i32_2 = arith.constant 0 : i32
    return %c0_i32, %c0_i32_0, %c0_i32_1 : i32, i32, i32
  }
  func.func @transform_2(%arg0: i32) -> (i32, i32) {
    %c0_i32 = arith.constant 0 : i32
    %c0_i32_0 = arith.constant 0 : i32
    %c0_i32_1 = arith.constant 0 : i32
    return %c0_i32, %c0_i32_0 : i32, i32
  }
  func.func @transform_3(%arg0: i32) -> (i32, i32) {
    %c0_i32 = arith.constant 0 : i32
    %c0_i32_0 = arith.constant 0 : i32
    %c0_i32_1 = arith.constant 0 : i32
    return %c0_i32, %c0_i32_0 : i32, i32
  }
  func.func @transform_4(%arg0: i32) -> (i32, i32, i32) {
    %c0_i32 = arith.constant 0 : i32
    %c0_i32_0 = arith.constant 0 : i32
    %c0_i32_1 = arith.constant 0 : i32
    return %arg0, %c0_i32, %c0_i32_0 : i32, i32, i32
  }
}

</mosaic_0001>

<bundles_post_ra>
// kernel: conv_bn_relu.2
= control target key start
LH: loop header
LB: loop body
LE: loop exit
PB: predicated region body
PF: predicated region fallthrough
CT: control target
= control target key end

     0   :  { %s339_s9 = smov 0   ;;  %s374_s0 = inlined_call_operand.vmem [shape: f32[2,4,16], index: 0, kind: input, shape index: {}]   ;;  %s375_s1 = inlined_call_operand.vmem [shape: bf16[3,8,4], index: 1, kind: input, shape index: {}]   ;;  %s376_s2 = inlined_call_operand.vmem [shape: f32[2,8,2], index: 2, kind: output, shape index: {}]  }
   0x1 LB: > { %s288_s10 = sadd.s32 4294967295, %s319_s9   ;;  %p292_p0 = scmp.ge.s32.totalorder %s319_s9, 1  ;;  %s319_s9 = sphi %s339_s9, %s12_s9  }
   0x2   : > { %p111_p1 = scmp.lt.s32.totalorder %s319_s9, 3 }
   0x4   : > { %p112_p2 = pnand %p292_p0, %p111_p1 }
   0x5   : > { %p131_p3 = scmp.lt.s32.totalorder (!%p112_p2), %s288_s10, 1  ;;  %s321_s15 = smov (!%p112_p2), 1  }
   0x6   : > { %115 = sbr.rel (%p112_p2) target bundleno = 511 (0x1ff), region = 28  ;;  %s322_s16 = smov (!%p112_p2), 127  }
   0x7   : > { %s323_s17 = smov (!%p112_p2), 126  }
   0xb   : > { %s378_s10 = smov (!%p131_p3, %s288_s10), 1  ;;  %vm145_vm0 = vcmask 7168   ;;  %vm147_vm1 = vcmask 138240   ;;  %vm162_vm2 = vcmask 1041408   ;;  %v150_v8 = vld [vmem:[%s375_s1] sm:$0xf] }
   0xc   : > { %s293_s11 = sshll.u32 %s378_s10, 2  ;;  %vm158_vm3 = vcmask 31744   ;;  %v295_v13 = vld [vmem:[%s375_s1 + $0x4] sm:$0xf]  ;;  %v298_v14 = vld [vmem:[%s375_s1 + $0x8] sm:$0xf] }
   0xd   : > { %s134_s14 = scalar_lea.vmem %s374_s0, %s293_s11  ;;  %vm222_vm4 = vcmask 130048   ;;  %s294_s24 = sshll.u32 %s378_s10, 3  ;;  %vm233_vm5 = vcmask 15368  }
   0xe   : > { %v140_v0 = vld [vmem:[%s134_s14] sm:$0xf]  ;;  %s138_s27 = scalar_lea.vmem %s376_s2, %s294_s24 }
   0xf   : > { %142 = vrot.lane.b32.xlu0 %v140_v0, %s321_s15 }
  0x81   : > { %v143_v1 = vpop.permute.xlu0 %142 }
  0x82   : > { %v146_v2 = vsel %vm145_vm0, 0.0, %v143_v1 }
  0x83   : > { %v148_v3 = vsel %vm147_vm1, %v146_v2, 0.0 }
  0x84   : > { %v149_v4 = vpack.c.bf16 %v148_v3, %v148_v3 }
  0x86   : > { %v183_v5 = vsel %vm162_vm2, %v149_v4, 0  ;;  %v154_v6 = vunpack.c.l.b16 %v149_v4 }
  0x87   : > { %192 = vmatpush.bf16.msra.mxu1 %v183_v5 }
  0x88   : > { %v155_v7 = vpack.c.b16 %v154_v6, %v154_v6 }
  0x8a   : > { %156 = vrot.lane.b32.xlu1 %v155_v7, %s322_s16  ;;  %200 = vrot.lane.b32.xlu0 %v155_v7, %s323_s17 }
  0x8b   : > { %297 = vmatmul.msk.bf16.vlgmr.msra.gmra.mxu1 %vm158_vm3, %v150_v8 }
  0xfc   : > { %v157_v9 = vpop.permute.xlu1 %156  ;;  %v201_v10 = vpop.permute.xlu0 %200 }
  0xfd   : > { %v164_v11 = vsel %vm162_vm2, %v157_v9, 0  ;;  %v206_v12 = vsel %vm162_vm2, %v201_v10, 0 }
  0xfe   : > { %173 = vmatpush.bf16.msra.mxu0 %v164_v11  ;;  %215 = vmatpush.bf16.msra.mxu2 %v206_v12 }
 0x101   : > { %296 = vmatmul.msk.bf16.vlgmr.msra.gmra.mxu0 %vm158_vm3, %v295_v13  ;;  %299 = vmatmul.msk.bf16.vlgmr.msra.gmra.mxu2 %vm158_vm3, %v298_v14 }
 0x108   : > { %v194_v15 = vpop.f32.mrf.mxu1 }
 0x110   : > { %v196_v16 = vpop.f32.mrf.mxu1 }
 0x17e   : > { %v175_v17 = vpop.f32.mrf.mxu0 }
 0x17f   : > { %v195_v18 = vadd.f32 %v194_v15, %v175_v17 }
 0x184   : > { %v217_v19 = vpop.f32.mrf.mxu2 }
 0x185   : > { %v221_v20 = vadd.f32 %v217_v19, %v195_v18 }
 0x186   : > { %v177_v21 = vpop.f32.mrf.mxu0 }
 0x187   : > { %v223_v22 = vsel %vm222_vm4, %v221_v20, 0.0  ;;  %v227_v23 = vmul.f32 %v221_v20, %v221_v20 }
 0x188   : > { %224 = vadd.xlane.f32.xlu1 %v223_v22 }
 0x189   : > { %v228_v24 = vsel %vm222_vm4, %v227_v23, 0.0 }
 0x18a   : > { %229 = vadd.xlane.f32.xlu2 %v228_v24 }
 0x18c   : > { %v219_v25 = vpop.f32.mrf.mxu2 }
 0x1fb   : > { %v225_v26 = vpop.xlane.xlu1 %224 }
 0x1fc   : > { %232 = vst.msk [vmem:[%s138_s27] sm:$0xff] %vm145_vm0, %v225_v26 }
 0x1fd   : > { %v230_v27 = vpop.xlane.xlu2 %229 }
 0x1fe   : > { %234 = vst.msk [vmem:[%s138_s27] sm:$0xff] %vm233_vm5, %v230_v27 }
 0x1ff PF: > { %s12_s9 = sadd.s32 1, %s319_s9  }
 0x200   : > { %p9_p4 = scmp.ge.s32.totalorder %s12_s9, 4  }
 0x202   :  { %11 = sbr.rel (!%p9_p4) target bundleno = 1 (0x1), region = 60 }

// kernel: conv_bn_relu.3
= control target key start
LH: loop header
LB: loop body
LE: loop exit
PB: predicated region body
PF: predicated region fallthrough
CT: control target
= control target key end

     0   :  { %9 = vsyncpa [#allocation3], 0  ;;  %s628_s0 = inlined_call_operand.vmem [shape: f32[2,4,16], index: 0, kind: input, shape index: {}]   ;;  %s629_s1 = inlined_call_operand.vmem [shape: bf16[3,8,4], index: 1, kind: input, shape index: {}]   ;;  %s630_s2 = inlined_call_operand.vmem [shape: f32[8,1], index: 2, kind: input, shape index: {}]   ;;  %s631_s3 = inlined_call_operand.vmem [shape: f32[8,1], index: 3, kind: input, shape index: {}]   ;;  %s632_s4 = inlined_call_operand.hbm [shape: f32[2,8,16], index: 4, kind: output, shape index: {}]  }
   0x1   :  { %11 = vsyncpa [#allocation3 + $0x1], 0  ;;  %s522_s15 = smov 0   ;;  %s524_s16 = smov 0  }
   0x2   :  { %s526_s17 = smov 0   ;;  %s528_s18 = smov 0  }
   0x3 LB: > { %s543_s19 = sadd.s32 4294967295, %s491_s18   ;;  %s368_s20 = sadd.s32 4294967294, %s491_s18   ;;  %s491_s18 = sphi %s528_s18, %s638_s18   ;;  %s487_s17 = sphi %s526_s17, %s637_s17   ;;  %s483_s16 = sphi %s524_s16, %s636_s16   ;;  %s479_s15 = sphi %s522_s15, %s635_s15  }
   0x4   : > { %s547_s21 = sadd.s32 1, %s491_s18   ;;  %s113_s22 = sadd.s32 1, %s487_s17 }
   0x5   : > { %s110_s23 = ssub.s32 %s491_s18, %s547_s21  ;;  %p123_p0 = scmp.ne.s32.totalorder %s487_s17, %s483_s16 }
   0x6   : > { %p111_p1 = scmp.eq.s32.totalorder %s110_s23, 0  ;;  %p124_p2 = scmp.eq.s32.totalorder %s543_s19, 1 }
   0x7   : > { %p129_p3 = scmp.ne.s32.totalorder %s483_s16, %s479_s15  ;;  %p130_p4 = scmp.eq.s32.totalorder %s368_s20, 1 }
   0x8   : > { %s558_s24 = scalar_select %p111_p1, %s487_s17, %s113_s22  }
   0x9   : > { %p560_p5 = por %p124_p2, %p123_p0  ;;  %p564_p6 = por %p130_p4, %p129_p3 }
   0xa   : > { %p371_p7 = scmp.ge.s32.totalorder %s491_s18, 1  ;;  %p164_p8 = scmp.lt.s32.totalorder %s491_s18, 3 }
   0xc   : > { %p165_p9 = pnand %p371_p7, %p164_p8 }
   0xd   : > { %p189_p10 = scmp.lt.s32.totalorder (!%p165_p9), %s543_s19, 1  ;;  %s493_s6 = smov (!%p165_p9), 1  }
   0xe   : > { %168 = sbr.rel (%p165_p9) target bundleno = 409 (0x199), region = 36  ;;  %s494_s7 = smov (!%p165_p9), 127  }
   0xf   : > { %s495_s8 = smov (!%p165_p9), 126   ;;  %s380_s30 = sshll.u32 (!%p165_p9), %s543_s19, 3 }
  0x10   : > { %s449_s20 = scalar_lea.hbm (!%p165_p9), %s632_s4, 16 }
  0x13   : > { %s190_s27 = scalar_select %p189_p10, %s543_s19, 1  ;;  %vm199_vm0 = vcmask 7168   ;;  %vm201_vm1 = vcmask 138240   ;;  %vm216_vm2 = vcmask 1041408   ;;  %v204_v8 = vld [vmem:[%s629_s1] sm:$0xf] }
  0x14   : > { %vm212_vm3 = vcmask 31744   ;;  %v276_v9 = vld [vmem:[%s630_s2] sm:$0xff]  ;;  %v496_v11 = vmov 0   ;;  %v377_v17 = vld [vmem:[%s629_s1 + $0x8] sm:$0xf]  ;;  %vm291_vm4 = vcmask 130048  }
  0x15   : > { %s373_s28 = sshll.u32 %s190_s27, 2  ;;  %v277_v10 = vld [vmem:[%s631_s3] sm:$0xff]  ;;  %426 = vset.pattern.permute.xlu1 %v496_v11  ;;  %427 = vset.pattern.permute.xlu2 %v496_v11 }
  0x16   : > { %s192_s5 = scalar_lea.vmem %s628_s0, %s373_s28  ;;  %286 = vperm.xlu2 %427, %v277_v10   ;;  %428 = vset.pattern.permute.xlu0 %v496_v11  ;;  %v374_v16 = vld [vmem:[%s629_s1 + $0x4] sm:$0xf]  ;;  %s186_s28 = sand.u32 1, %s483_s16  }
  0x17   : > { %v194_v0 = vld [vmem:[%s192_s5] sm:$0xf]  ;;  %s372_s29 = sshll.u32 %s186_s28, 3  ;;  %s294_s19 = scalar_lea.sflag [#allocation3], %s186_s28 }
  0x18   : > { %196 = vrot.lane.b32.xlu0 %v194_v0, %s493_s6 }
  0x70   : > { %v287_v26 = vpop.permute.xlu2 %286 }
  0x8a   : > { %v197_v1 = vpop.permute.xlu0 %196 }
  0x8b   : > { %v200_v2 = vsel %vm199_vm0, 0.0, %v197_v1 }
  0x8c   : > { %v202_v3 = vsel %vm201_vm1, %v200_v2, 0.0 }
  0x8d   : > { %v203_v4 = vpack.c.bf16 %v202_v3, %v202_v3 }
  0x8f   : > { %v237_v5 = vsel %vm216_vm2, %v203_v4, 0  ;;  %v208_v6 = vunpack.c.l.b16 %v203_v4 }
  0x90   : > { %246 = vmatpush.bf16.msra.mxu1 %v237_v5 }
  0x91   : > { %v209_v7 = vpack.c.b16 %v208_v6, %v208_v6 }
  0x93   : > { %210 = vrot.lane.b32.xlu1 %v209_v7, %s494_s7  ;;  %254 = vrot.lane.b32.xlu0 %v209_v7, %s495_s8  ;;  %s304_s7 = scalar_lea.hbm %s632_s4, %s380_s30  ;;  %s188_s8 = scalar_lea.vmem [#allocation2], %s372_s29 }
  0x94   : > { %376 = vmatmul.msk.bf16.vlgmr.msra.gmra.mxu1 %vm212_vm3, %v204_v8  ;;  %s306_s9 = sshll.u32 %s188_s8, 4  ;;  %s308_s10 = sshll.u32 %s304_s7, 4  ;;  %s307_s9 = int_to_ptr.vmem [resolvable:$true] %s306_s9  ;;  %s309_s10 = int_to_ptr.hbm [resolvable:$true] %s308_s10 }
  0x95   : > { %s443_s11 = sshra.s32 %s309_s10, 4  ;;  %s444_s11 = int_to_ptr.hbm [resolvable:$true] %s443_s11 }
  0x96   : > { %s445_s12 = scalar_lea.hbm %s444_s11, 8  ;;  %p450_p0 = scmp.lt.s32.totalorder %s444_s11, %s632_s4 }
  0x97   : > { %p446_p11 = scmp.ne.s32.totalorder %s444_s11, %s445_s12  ;;  %p451_p1 = scmp.lt.s32.totalorder %s449_s20, %s445_s12 }
  0x99   : > { %p447_p12 = pnand %p446_p11, %p560_p5  ;;  %p452_p2 = por %p451_p1, %p450_p0 }
  0x9b   : > { %280 = vperm.xlu1 %426, %v276_v9   ;;  %p448_p13 = pneg %p447_p12 }
  0x9d   : > { %p453_p3 = pnand %p452_p2, %p448_p13 }
 0x105   : > { %v211_v12 = vpop.permute.xlu1 %210  ;;  %v255_v13 = vpop.permute.xlu0 %254 }
 0x106   : > { %v218_v14 = vsel %vm216_vm2, %v211_v12, 0  ;;  %v260_v15 = vsel %vm216_vm2, %v255_v13, 0 }
 0x107   : > { %227 = vmatpush.bf16.msra.mxu0 %v218_v14  ;;  %269 = vmatpush.bf16.msra.mxu2 %v260_v15 }
 0x10a   : > { %375 = vmatmul.msk.bf16.vlgmr.msra.gmra.mxu0 %vm212_vm3, %v374_v16  ;;  %378 = vmatmul.msk.bf16.vlgmr.msra.gmra.mxu2 %vm212_vm3, %v377_v17 }
 0x10d   : > { %v281_v23 = vpop.permute.xlu1 %280 }
 0x111   : > { %v248_v18 = vpop.f32.mrf.mxu1 }
 0x119   : > { %v250_v19 = vpop.f32.mrf.mxu1 }
 0x187   : > { %v229_v20 = vpop.f32.mrf.mxu0 }
 0x188   : > { %v249_v21 = vadd.f32 %v248_v18, %v229_v20 }
 0x18d   : > { %v271_v22 = vpop.f32.mrf.mxu2 }
 0x18e   : > { %v275_v24 = vadd.f32 %v271_v22, %v249_v21 }
 0x18f   : > { %v231_v25 = vpop.f32.mrf.mxu0 }
 0x190   : > { %v283_v27 = vmul.f32 %v281_v23, %v275_v24 }
 0x192   : > { %v289_v28 = vadd.f32 %v287_v26, %v283_v27 }
 0x194   : > { %v290_v29 = vmax.f32 %v289_v28, 0.0 }
 0x195   : > { %v273_v30 = vpop.f32.mrf.mxu2 }
 0x196   : > { %292 = vst.msk [vmem:[%s188_s8] sm:$0xff] %vm291_vm4, %v290_v29 }
 0x197   : > { %456 = shalt.err (!%p453_p3)
}
 0x198   : > { %383 = dma.vmem_to_hbm [thread:$0]  (%p560_p5), %s307_s9, 128, %s309_s10, %s294_s19  }
 0x199 PF: > { %p389_p4 = scmp.ge.s32.totalorder %s491_s18, 2  ;;  %s320_s27 = sand.u32 1, %s479_s15  }
 0x19a   : > { %s321_s28 = scalar_lea.sflag [#allocation3], %s320_s27 }
 0x19b   : > { %p386_p7 = pnand %p389_p4, %p564_p6 }
 0x19d   : > { %p387_p8 = pneg %p386_p7 }
 0x19f   : > { %474 = dma.done.wait (%p387_p8), %s321_s28, 128  }
 0x1a0   : > { %476 = vsyncadd (%p387_p8), %s321_s28, 4294967168  ;;  %p14_p9 = scmp.ge.s32.totalorder %s547_s21, 4   ;;  %s635_s15 = smov %s483_s16 }
 0x1a1   : > { %s636_s16 = smov %s487_s17  ;;  %s637_s17 = smov %s558_s24 }
 0x1a2   : > { %s638_s18 = smov %s547_s21  ;;  %16 = sbr.rel (!%p14_p9) target bundleno = 3 (0x3), region = 73 }
 0x1a7   :  { %327 = vsyncpa [#allocation3], 1 }
 0x1a8   :  { %329 = vsyncpa [#allocation3 + $0x1], 1 }

</bundles_post_ra>
